<compile_context>
chip_gen: v6e
topology: v6e:2x2x1
jax: 0.10.0
libtpu: 0.0.40
codegen_flags: <defaults>
</compile_context>

<pallas_src>
import jax
import jax.numpy as jnp
from jax.experimental import pallas as pl
from jax.experimental.pallas import tpu as pltpu


LANE = 128
SUBLANE = 8


def _round_up(x, m):
    return ((x + m - 1) // m) * m


def cfconv_kernel(src_ref,                   # (1, TE)  int32   src ids of this edge tile
                  dst_ref,                   # (1, TE)  int32   dst ids of this edge tile
                  x_ref,                     # (N_p, Din_p) f32 node features (resident)
                  eb_ref,                    # (TE, R_p)   bf16 edge basis tile
                  w_pre_ref, b_pre_ref,      # (Din_p, H_p) f32, (1, H_p) f32
                  w_rf_ref, b_rf_ref,        # (R_p, H_p) bf16, (1, H_p) f32
                  w_post_ref, b_post_ref,    # (H_p, Dout_p) f32, (1, Dout_p) f32
                  o_ref,                     # (N_p, Dout_p) f32 output (resident)
                  xpre_ref,                  # scratch (N_p, H_p) bf16  (x_pre copy)
                  acc_ref):                  # scratch (N_p, H_p) f32   (scatter accumulator)
    t = pl.program_id(0)
    n_tiles = pl.num_programs(0)
    te = eb_ref.shape[0]
    n_pad = acc_ref.shape[0]

    # ---- once, at the first edge tile: pre-Linear + accumulator init -------
    @pl.when(t == 0)
    def _init():
        xpre = (jnp.dot(x_ref[...], w_pre_ref[...],
                        preferred_element_type=jnp.float32) + b_pre_ref[...])
        xpre_ref[...] = xpre.astype(xpre_ref.dtype)     # bf16 copy for the MXU gather
        acc_ref[...] = jnp.zeros_like(acc_ref)

    # ---- radial filters for this edge tile: Linear(d_radial -> d_hidden) ---
    # bf16 operands, f32 accumulation.
    filt = (jnp.dot(eb_ref[...], w_rf_ref[...],
                    preferred_element_type=jnp.float32) + b_rf_ref[...])    # (TE, H_p) f32

    # ---- one-hot gather / scatter matrices, both (N_p, TE), exact in bf16 --
    # Out-of-range indices (padded edges, bad inputs) hit an all-zero row/col.
    node_iota = jax.lax.broadcasted_iota(jnp.int32, (n_pad, te), 0)
    onehot_src = jnp.where(src_ref[...] == node_iota, 1.0, 0.0).astype(jnp.bfloat16)
    onehot_dst = jnp.where(dst_ref[...] == node_iota, 1.0, 0.0).astype(jnp.bfloat16)

    # ---- MXU gather: gathered[e, h] = x_pre[src[e], h] ---------------------
    gathered = jax.lax.dot_general(
        onehot_src, xpre_ref[...],
        dimension_numbers=(((0,), (0,)), ((), ())),       # contract the node axis
        preferred_element_type=jnp.float32)               # (TE, H_p) f32

    # ---- edge messages + MXU scatter-add into the resident accumulator -----
    msg = (gathered * filt).astype(jnp.bfloat16)          # (TE, H_p)
    acc_ref[...] += jnp.dot(onehot_dst, msg, preferred_element_type=jnp.float32)

    # ---- once, after the last edge tile: post-Linear + SiLU ----------------
    @pl.when(t == n_tiles - 1)
    def _finalize():
        z = (jnp.dot(acc_ref[...], w_post_ref[...],
                     preferred_element_type=jnp.float32) + b_post_ref[...])
        o_ref[...] = z * jax.nn.sigmoid(z)


def cfconv(x, edge_basis, src_idx, dst_idx, params, *, edge_tile=1024):
    """x: (N, d_in) f32, edge_basis: (E, d_radial) f32,
    src_idx / dst_idx: (E,) int32 (out-of-range indices contribute nothing)."""
    n_nodes, d_in = x.shape
    n_edges, d_radial = edge_basis.shape
    d_hidden = params["w_pre"].shape[0]
    d_out = params["w_post"].shape[0]

    # -- padded shapes: channel dims lane-dense, radial dim only sublane-padded
    n_p = _round_up(n_nodes, SUBLANE)
    din_p = _round_up(d_in, LANE)
    dr_p = _round_up(d_radial, SUBLANE)          # NOT padded to 128 (HBM stream stays thin)
    h_p = _round_up(d_hidden, LANE)
    dout_p = _round_up(d_out, LANE)
    te = _round_up(max(LANE, min(edge_tile, _round_up(max(n_edges, 1), LANE))), LANE)
    e_p = _round_up(max(n_edges, 1), te)         # >= 1 tile even for an empty edge set
    n_tiles = e_p // te

    def pad2(a, r, c):
        return jnp.zeros((r, c), a.dtype).at[:a.shape[0], :a.shape[1]].set(a)

    x_p = pad2(x.astype(jnp.float32), n_p, din_p)
    eb_p = pad2(edge_basis.astype(jnp.bfloat16), e_p, dr_p)

    # Padded src/dst -> n_p (out of iota range) => zero one-hot row/column =>
    # padded edges produce exactly zero messages AND scatter nowhere.
    src_p = jnp.full((e_p,), n_p, jnp.int32).at[:n_edges].set(src_idx.astype(jnp.int32))
    dst_p = jnp.full((e_p,), n_p, jnp.int32).at[:n_edges].set(dst_idx.astype(jnp.int32))
    src_row = src_p.reshape(1, e_p)
    dst_row = dst_p.reshape(1, e_p)

    w_pre_t = pad2(params["w_pre"].T.astype(jnp.float32), din_p, h_p)
    w_rf_t = pad2(params["w_rf"].T.astype(jnp.bfloat16), dr_p, h_p)
    w_post_t = pad2(params["w_post"].T.astype(jnp.float32), h_p, dout_p)
    b_pre = pad2(params["b_pre"].reshape(1, -1).astype(jnp.float32), 1, h_p)
    b_rf = pad2(params["b_rf"].reshape(1, -1).astype(jnp.float32), 1, h_p)
    b_post = pad2(params["b_post"].reshape(1, -1).astype(jnp.float32), 1, dout_p)

    # -- VMEM budget (lane-padded, double-buffered streams + resident blocks) --
    I32, F32, BF16 = 4, 4, 2
    vmem_est = (
        2 * (te * max(dr_p, LANE) * BF16 + 2 * SUBLANE * te * I32)        # edge tiles x2 bufs
        + 2 * (n_p * din_p * F32 + din_p * h_p * F32                      # resident inputs x2
               + max(dr_p, 16) * h_p * BF16 + h_p * dout_p * F32
               + SUBLANE * (2 * h_p + dout_p) * F32)
        + 2 * n_p * dout_p * F32                                          # output x2
        + n_p * h_p * (BF16 + F32)                                        # x_pre + acc scratch
        + 2 * n_p * te * BF16 + te * h_p * (2 * F32 + BF16)               # per-tile temporaries
    )
    # Generation-aware ceiling: ~3/4 of physical VMEM (~48 MiB on v7x, ~96 MiB on v5e/v6e).
    try:
        vmem_cap = int(getattr(pltpu.get_tpu_info(), "vmem_capacity_bytes",
                               64 * 1024 * 1024))
    except Exception:
        vmem_cap = 64 * 1024 * 1024
    vmem_ceiling = (3 * vmem_cap) // 4
    vmem_limit = int(min(max(2 * vmem_est, 8 * 1024 * 1024), vmem_ceiling))

    grid_spec = pltpu.PrefetchScalarGridSpec(
        num_scalar_prefetch=0,
        grid=(n_tiles,),
        in_specs=[
            pl.BlockSpec((1, te), lambda t: (0, t)),           # src ids (edge-tiled)
            pl.BlockSpec((1, te), lambda t: (0, t)),           # dst ids (edge-tiled)
            pl.BlockSpec((n_p, din_p), lambda t: (0, 0)),      # x (resident)
            pl.BlockSpec((te, dr_p), lambda t: (t, 0)),        # edge basis (edge-tiled, thin)
            pl.BlockSpec((din_p, h_p), lambda t: (0, 0)),      # W_pre^T
            pl.BlockSpec((1, h_p), lambda t: (0, 0)),          # b_pre
            pl.BlockSpec((dr_p, h_p), lambda t: (0, 0)),       # W_rf^T (bf16)
            pl.BlockSpec((1, h_p), lambda t: (0, 0)),          # b_rf
            pl.BlockSpec((h_p, dout_p), lambda t: (0, 0)),     # W_post^T
            pl.BlockSpec((1, dout_p), lambda t: (0, 0)),       # b_post
        ],
        out_specs=pl.BlockSpec((n_p, dout_p), lambda t: (0, 0)),
        scratch_shapes=[
            pltpu.VMEM((n_p, h_p), jnp.bfloat16),   # x_pre (bf16 copy for the MXU gather)
            pltpu.VMEM((n_p, h_p), jnp.float32),    # scatter accumulator (f32)
        ],
    )

    out_p = pl.pallas_call(
        cfconv_kernel,
        out_shape=jax.ShapeDtypeStruct((n_p, dout_p), jnp.float32),
        grid_spec=grid_spec,
        compiler_params=pltpu.CompilerParams(
            dimension_semantics=("arbitrary",),     # edge axis is a carried reduction
            vmem_limit_bytes=vmem_limit,
        ),
    )(src_row, dst_row, x_p, eb_p, w_pre_t, b_pre, w_rf_t, b_rf, w_post_t, b_post)

    return out_p[:n_nodes, :d_out]


def cfconv_reference(x, edge_basis, src_idx, dst_idx, params):
    """Plain-JAX f32 reference for correctness check."""
    x_pre = x @ params["w_pre"].T + params["b_pre"]
    filt = edge_basis @ params["w_rf"].T + params["b_rf"]
    msg = x_pre[src_idx] * filt
    h = jax.ops.segment_sum(msg, dst_idx, num_segments=x.shape[0])
    z = h @ params["w_post"].T + params["b_post"]
    return z * jax.nn.sigmoid(z)


def init_params(key, d_in, d_radial, d_hidden, d_out):
    """Deterministic init mirroring the module's reset_parameters()."""
    k1, k2, k3 = jax.random.split(key, 3)
    # kaiming_normal_, nonlinearity='linear', mode='fan_in': std = 1/sqrt(fan_in)
    w_pre = jax.random.normal(k1, (d_hidden, d_in), jnp.float32) / jnp.sqrt(d_in)
    w_rf = jax.random.normal(k2, (d_hidden, d_radial), jnp.float32) / jnp.sqrt(d_radial)
    # kaiming_normal_, nonlinearity='relu': std = sqrt(2/fan_in)
    w_post = jax.random.normal(k3, (d_out, d_hidden), jnp.float32) * jnp.sqrt(2.0 / d_hidden)
    return {
        "w_pre": w_pre, "b_pre": jnp.zeros((d_hidden,), jnp.float32),
        "w_rf": w_rf, "b_rf": jnp.zeros((d_hidden,), jnp.float32),
        "w_post": w_post, "b_post": jnp.zeros((d_out,), jnp.float32),
    }


if __name__ == "__main__":
    # Small synthetic graph: 16 nodes, 64 edges.
    N, E = 16, 64
    d_in, d_radial, d_hidden, d_out = 32, 16, 32, 32

    key = jax.random.PRNGKey(0)
    kx, ke, ks, kd, kp = jax.random.split(key, 5)

    x = jax.random.normal(kx, (N, d_in), jnp.float32)
    edge_basis = jax.random.normal(ke, (E, d_radial), jnp.float32)
    src_idx = jax.random.randint(ks, (E,), 0, N, dtype=jnp.int32)
    dst_idx = jax.random.randint(kd, (E,), 0, N, dtype=jnp.int32)
    params = init_params(kp, d_in, d_radial, d_hidden, d_out)

    out = cfconv(x, edge_basis, src_idx, dst_idx, params)
    out = jax.block_until_ready(out)

    ref = cfconv_reference(x, edge_basis, src_idx, dst_idx, params)
    assert out.shape == (N, d_out)
    # Tolerance accounts for the bf16 MXU operands (one-hots are exact; x_pre /
    # filt / msg carry ~1e-3 relative bf16 rounding, accumulation is f32).
    assert jnp.allclose(out, ref, atol=1e-1, rtol=5e-2), "mismatch vs reference"

    print("KERNEL_OK")
</pallas_src>

<mosaic_0001>
module attributes {stable_mosaic.version = 11 : i64} {
  func.func @cfconv_kernel(%arg0: i32, %arg1: memref<1x128xi32, #tpu.memory_space<vmem>>, %arg2: memref<1x128xi32, #tpu.memory_space<vmem>>, %arg3: memref<16x128xf32, #tpu.memory_space<vmem>>, %arg4: memref<128x16xbf16, #tpu.memory_space<vmem>>, %arg5: memref<128x128xf32, #tpu.memory_space<vmem>>, %arg6: memref<1x128xf32, #tpu.memory_space<vmem>>, %arg7: memref<16x128xbf16, #tpu.memory_space<vmem>>, %arg8: memref<1x128xf32, #tpu.memory_space<vmem>>, %arg9: memref<128x128xf32, #tpu.memory_space<vmem>>, %arg10: memref<1x128xf32, #tpu.memory_space<vmem>>, %arg11: memref<16x128xf32, #tpu.memory_space<vmem>>, %arg12: memref<16x128xbf16, #tpu.memory_space<vmem>>, %arg13: memref<16x128xf32, #tpu.memory_space<vmem>>) attributes {dimension_semantics = [#tpu.dimension_semantics<arbitrary>], iteration_bounds = array<i64: 1>, scalar_prefetch = 0 : i64, scratch_operands = 2 : i64, tpu.core_type = #tpu.core_type<tc>, window_params = [{transform_indices = @transform_0, window_bounds = array<i64: 1, 128>}, {transform_indices = @transform_1, window_bounds = array<i64: 1, 128>}, {pipeline_mode = #tpu.pipeline_mode<synchronous>, transform_indices = @transform_2, window_bounds = array<i64: 16, 128>}, {transform_indices = @transform_3, window_bounds = array<i64: 128, 16>}, {pipeline_mode = #tpu.pipeline_mode<synchronous>, transform_indices = @transform_4, window_bounds = array<i64: 128, 128>}, {pipeline_mode = #tpu.pipeline_mode<synchronous>, transform_indices = @transform_5, window_bounds = array<i64: 1, 128>}, {pipeline_mode = #tpu.pipeline_mode<synchronous>, transform_indices = @transform_6, window_bounds = array<i64: 16, 128>}, {pipeline_mode = #tpu.pipeline_mode<synchronous>, transform_indices = @transform_7, window_bounds = array<i64: 1, 128>}, {pipeline_mode = #tpu.pipeline_mode<synchronous>, transform_indices = @transform_8, window_bounds = array<i64: 128, 128>}, {pipeline_mode = #tpu.pipeline_mode<synchronous>, transform_indices = @transform_9, window_bounds = array<i64: 1, 128>}, {pipeline_mode = #tpu.pipeline_mode<synchronous>, transform_indices = @transform_10, window_bounds = array<i64: 16, 128>}]} {
    %c0_i32 = arith.constant 0 : i32
    %0 = arith.cmpi eq, %arg0, %c0_i32 : i32
    %1 = arith.extui %0 : i1 to i32
    %c0_i32_0 = arith.constant 0 : i32
    %2 = arith.cmpi ne, %1, %c0_i32_0 : i32
    scf.if %2 {
      %c0_24 = arith.constant 0 : index
      %c0_25 = arith.constant 0 : index
      %35 = vector.load %arg3[%c0_24, %c0_25] : memref<16x128xf32, #tpu.memory_space<vmem>>, vector<16x128xf32>
      %c0_26 = arith.constant 0 : index
      %c0_27 = arith.constant 0 : index
      %36 = vector.load %arg5[%c0_26, %c0_27] : memref<128x128xf32, #tpu.memory_space<vmem>>, vector<128x128xf32>
      %cst_28 = arith.constant dense<0.000000e+00> : vector<16x128xf32>
      %37 = tpu.matmul %35, %36, %cst_28 {dimension_numbers = #tpu.dot_dimension_numbers<[1], [0], [0], [1], [0, 0, 1, 1], [], []>} : vector<16x128xf32>, vector<128x128xf32>, vector<16x128xf32> -> vector<16x128xf32>
      %c0_29 = arith.constant 0 : index
      %c0_30 = arith.constant 0 : index
      %38 = vector.load %arg6[%c0_29, %c0_30] : memref<1x128xf32, #tpu.memory_space<vmem>>, vector<1x128xf32>
      %39 = vector.broadcast %38 : vector<1x128xf32> to vector<16x128xf32>
      %40 = arith.addf %37, %39 : vector<16x128xf32>
      %41 = arith.truncf %40 : vector<16x128xf32> to vector<16x128xbf16>
      %c0_31 = arith.constant 0 : index
      %c0_32 = arith.constant 0 : index
      %42 = vector.load %arg12[%c0_31, %c0_32] : memref<16x128xbf16, #tpu.memory_space<vmem>>, vector<16x128xbf16>
      tpu.vector_store %arg12[%c0_31, %c0_32], %41 {strides = array<i32>} : memref<16x128xbf16, #tpu.memory_space<vmem>>, vector<16x128xbf16>,
      %cst_33 = arith.constant 0.000000e+00 : f32
      %43 = vector.broadcast %cst_33 : f32 to vector<16x128xf32>
      %c0_34 = arith.constant 0 : index
      %c0_35 = arith.constant 0 : index
      %44 = vector.load %arg13[%c0_34, %c0_35] : memref<16x128xf32, #tpu.memory_space<vmem>>, vector<16x128xf32>
      tpu.vector_store %arg13[%c0_34, %c0_35], %43 {strides = array<i32>} : memref<16x128xf32, #tpu.memory_space<vmem>>, vector<16x128xf32>,
    } else {
    }
    %c0 = arith.constant 0 : index
    %c0_1 = arith.constant 0 : index
    %3 = vector.load %arg4[%c0, %c0_1] : memref<128x16xbf16, #tpu.memory_space<vmem>>, vector<128x16xbf16>
    %c0_2 = arith.constant 0 : index
    %c0_3 = arith.constant 0 : index
    %4 = vector.load %arg7[%c0_2, %c0_3] : memref<16x128xbf16, #tpu.memory_space<vmem>>, vector<16x128xbf16>
    %cst = arith.constant dense<0.000000e+00> : vector<128x128xf32>
    %5 = tpu.matmul %3, %4, %cst {dimension_numbers = #tpu.dot_dimension_numbers<[1], [0], [0], [1], [0, 0, 1, 1], [], []>} : vector<128x16xbf16>, vector<16x128xbf16>, vector<128x128xf32> -> vector<128x128xf32>
    %c0_4 = arith.constant 0 : index
    %c0_5 = arith.constant 0 : index
    %6 = vector.load %arg8[%c0_4, %c0_5] : memref<1x128xf32, #tpu.memory_space<vmem>>, vector<1x128xf32>
    %7 = vector.broadcast %6 : vector<1x128xf32> to vector<128x128xf32>
    %8 = arith.addf %5, %7 : vector<128x128xf32>
    %9 = tpu.iota {dimensions = array<i32: 0>} : vector<16x128xi32>
    %c0_6 = arith.constant 0 : index
    %c0_7 = arith.constant 0 : index
    %10 = vector.load %arg1[%c0_6, %c0_7] : memref<1x128xi32, #tpu.memory_space<vmem>>, vector<1x128xi32>
    %11 = vector.broadcast %10 : vector<1x128xi32> to vector<16x128xi32>
    %12 = arith.cmpi eq, %11, %9 : vector<16x128xi32>
    %cst_8 = arith.constant 1.000000e+00 : f32
    %cst_9 = arith.constant 0.000000e+00 : f32
    %13 = vector.broadcast %cst_8 : f32 to vector<16x128xf32>
    %14 = vector.broadcast %cst_9 : f32 to vector<16x128xf32>
    %15 = arith.select %12, %13, %14 : vector<16x128xi1>, vector<16x128xf32>
    %16 = arith.truncf %15 : vector<16x128xf32> to vector<16x128xbf16>
    %c0_10 = arith.constant 0 : index
    %c0_11 = arith.constant 0 : index
    %17 = vector.load %arg2[%c0_10, %c0_11] : memref<1x128xi32, #tpu.memory_space<vmem>>, vector<1x128xi32>
    %18 = vector.broadcast %17 : vector<1x128xi32> to vector<16x128xi32>
    %19 = arith.cmpi eq, %18, %9 : vector<16x128xi32>
    %cst_12 = arith.constant 1.000000e+00 : f32
    %cst_13 = arith.constant 0.000000e+00 : f32
    %20 = vector.broadcast %cst_12 : f32 to vector<16x128xf32>
    %21 = vector.broadcast %cst_13 : f32 to vector<16x128xf32>
    %22 = arith.select %19, %20, %21 : vector<16x128xi1>, vector<16x128xf32>
    %23 = arith.truncf %22 : vector<16x128xf32> to vector<16x128xbf16>
    %c0_14 = arith.constant 0 : index
    %c0_15 = arith.constant 0 : index
    %24 = vector.load %arg12[%c0_14, %c0_15] : memref<16x128xbf16, #tpu.memory_space<vmem>>, vector<16x128xbf16>
    %cst_16 = arith.constant dense<0.000000e+00> : vector<128x128xf32>
    %25 = tpu.matmul %16, %24, %cst_16 {dimension_numbers = #tpu.dot_dimension_numbers<[0], [0], [1], [1], [0, 1, 1, 1], [], []>} : vector<16x128xbf16>, vector<16x128xbf16>, vector<128x128xf32> -> vector<128x128xf32>
    %26 = arith.mulf %25, %8 : vector<128x128xf32>
    %27 = arith.truncf %26 : vector<128x128xf32> to vector<128x128xbf16>
    %c0_17 = arith.constant 0 : index
    %c0_18 = arith.constant 0 : index
    %28 = vector.load %arg13[%c0_17, %c0_18] : memref<16x128xf32, #tpu.memory_space<vmem>>, vector<16x128xf32>
    %cst_19 = arith.constant dense<0.000000e+00> : vector<16x128xf32>
    %29 = tpu.matmul %23, %27, %cst_19 {dimension_numbers = #tpu.dot_dimension_numbers<[1], [0], [0], [1], [0, 0, 1, 1], [], []>} : vector<16x128xbf16>, vector<128x128xbf16>, vector<16x128xf32> -> vector<16x128xf32>
    %30 = arith.addf %28, %29 : vector<16x128xf32>
    %c0_20 = arith.constant 0 : index
    %c0_21 = arith.constant 0 : index
    %31 = vector.load %arg13[%c0_20, %c0_21] : memref<16x128xf32, #tpu.memory_space<vmem>>, vector<16x128xf32>
    tpu.vector_store %arg13[%c0_20, %c0_21], %30 {strides = array<i32>} : memref<16x128xf32, #tpu.memory_space<vmem>>, vector<16x128xf32>,
    %c0_i32_22 = arith.constant 0 : i32
    %32 = arith.cmpi eq, %arg0, %c0_i32_22 : i32
    %33 = arith.extui %32 : i1 to i32
    %c0_i32_23 = arith.constant 0 : i32
    %34 = arith.cmpi ne, %33, %c0_i32_23 : i32
    scf.if %34 {
      %c0_24 = arith.constant 0 : index
      %c0_25 = arith.constant 0 : index
      %35 = vector.load %arg13[%c0_24, %c0_25] : memref<16x128xf32, #tpu.memory_space<vmem>>, vector<16x128xf32>
      %c0_26 = arith.constant 0 : index
      %c0_27 = arith.constant 0 : index
      %36 = vector.load %arg9[%c0_26, %c0_27] : memref<128x128xf32, #tpu.memory_space<vmem>>, vector<128x128xf32>
      %cst_28 = arith.constant dense<0.000000e+00> : vector<16x128xf32>
      %37 = tpu.matmul %35, %36, %cst_28 {dimension_numbers = #tpu.dot_dimension_numbers<[1], [0], [0], [1], [0, 0, 1, 1], [], []>} : vector<16x128xf32>, vector<128x128xf32>, vector<16x128xf32> -> vector<16x128xf32>
      %c0_29 = arith.constant 0 : index
      %c0_30 = arith.constant 0 : index
      %38 = vector.load %arg10[%c0_29, %c0_30] : memref<1x128xf32, #tpu.memory_space<vmem>>, vector<1x128xf32>
      %39 = vector.broadcast %38 : vector<1x128xf32> to vector<16x128xf32>
      %40 = arith.addf %37, %39 : vector<16x128xf32>
      %41 = arith.negf %40 : vector<16x128xf32>
      %42 = math.exp %41 : vector<16x128xf32>
      %cst_31 = arith.constant 1.000000e+00 : f32
      %43 = vector.broadcast %cst_31 : f32 to vector<16x128xf32>
      %44 = arith.addf %43, %42 : vector<16x128xf32>
      %45 = arith.divf %43, %44 : vector<16x128xf32>
      %46 = arith.mulf %40, %45 : vector<16x128xf32>
      %c0_32 = arith.constant 0 : index
      %c0_33 = arith.constant 0 : index
      %47 = vector.load %arg11[%c0_32, %c0_33] : memref<16x128xf32, #tpu.memory_space<vmem>>, vector<16x128xf32>
      tpu.vector_store %arg11[%c0_32, %c0_33], %46 {strides = array<i32>} : memref<16x128xf32, #tpu.memory_space<vmem>>, vector<16x128xf32>,
    } else {
    }
    return
  }
  func.func @transform_0(%arg0: i32) -> (i32, i32) {
    %c0_i32 = arith.constant 0 : i32
    %c0_i32_0 = arith.constant 0 : i32
    return %c0_i32, %arg0 : i32, i32
  }
  func.func @transform_1(%arg0: i32) -> (i32, i32) {
    %c0_i32 = arith.constant 0 : i32
    %c0_i32_0 = arith.constant 0 : i32
    return %c0_i32, %arg0 : i32, i32
  }
  func.func @transform_2(%arg0: i32) -> (i32, i32) {
    %c0_i32 = arith.constant 0 : i32
    %c0_i32_0 = arith.constant 0 : i32
    %c0_i32_1 = arith.constant 0 : i32
    return %c0_i32, %c0_i32_0 : i32, i32
  }
  func.func @transform_3(%arg0: i32) -> (i32, i32) {
    %c0_i32 = arith.constant 0 : i32
    %c0_i32_0 = arith.constant 0 : i32
    return %arg0, %c0_i32 : i32, i32
  }
  func.func @transform_4(%arg0: i32) -> (i32, i32) {
    %c0_i32 = arith.constant 0 : i32
    %c0_i32_0 = arith.constant 0 : i32
    %c0_i32_1 = arith.constant 0 : i32
    return %c0_i32, %c0_i32_0 : i32, i32
  }
  func.func @transform_5(%arg0: i32) -> (i32, i32) {
    %c0_i32 = arith.constant 0 : i32
    %c0_i32_0 = arith.constant 0 : i32
    %c0_i32_1 = arith.constant 0 : i32
    return %c0_i32, %c0_i32_0 : i32, i32
  }
  func.func @transform_6(%arg0: i32) -> (i32, i32) {
    %c0_i32 = arith.constant 0 : i32
    %c0_i32_0 = arith.constant 0 : i32
    %c0_i32_1 = arith.constant 0 : i32
    return %c0_i32, %c0_i32_0 : i32, i32
  }
  func.func @transform_7(%arg0: i32) -> (i32, i32) {
    %c0_i32 = arith.constant 0 : i32
    %c0_i32_0 = arith.constant 0 : i32
    %c0_i32_1 = arith.constant 0 : i32
    return %c0_i32, %c0_i32_0 : i32, i32
  }
  func.func @transform_8(%arg0: i32) -> (i32, i32) {
    %c0_i32 = arith.constant 0 : i32
    %c0_i32_0 = arith.constant 0 : i32
    %c0_i32_1 = arith.constant 0 : i32
    return %c0_i32, %c0_i32_0 : i32, i32
  }
  func.func @transform_9(%arg0: i32) -> (i32, i32) {
    %c0_i32 = arith.constant 0 : i32
    %c0_i32_0 = arith.constant 0 : i32
    %c0_i32_1 = arith.constant 0 : i32
    return %c0_i32, %c0_i32_0 : i32, i32
  }
  func.func @transform_10(%arg0: i32) -> (i32, i32) {
    %c0_i32 = arith.constant 0 : i32
    %c0_i32_0 = arith.constant 0 : i32
    %c0_i32_1 = arith.constant 0 : i32
    return %c0_i32, %c0_i32_0 : i32, i32
  }
}

</mosaic_0001>

<bundles_post_ra>
// kernel: tpu_custom_call.1
= control target key start
LH: loop header
LB: loop body
LE: loop exit
PB: predicated region body
PF: predicated region fallthrough
CT: control target
= control target key end

     0   :  { %15 = vsyncpa [#allocation5], 0  ;;  %s1259_s0 = inlined_call_operand.vmem [shape: s32[1,128], index: 0, kind: input, shape index: {}]   ;;  %s1260_s1 = inlined_call_operand.vmem [shape: s32[1,128], index: 1, kind: input, shape index: {}]   ;;  %s1261_s2 = inlined_call_operand.vmem [shape: f32[16,128], index: 2, kind: input, shape index: {}]   ;;  %s1262_s3 = inlined_call_operand.vmem [shape: bf16[128,16], index: 3, kind: input, shape index: {}]   ;;  %s1263_s4 = inlined_call_operand.hbm [shape: f32[128,128], index: 4, kind: input, shape index: {}]   ;;  %s1264_s5 = inlined_call_operand.vmem [shape: f32[1,128], index: 5, kind: input, shape index: {}]   ;;  %s1265_s6 = inlined_call_operand.vmem [shape: bf16[16,128], index: 6, kind: input, shape index: {}]   ;;  %s1266_s7 = inlined_call_operand.vmem [shape: f32[1,128], index: 7, kind: input, shape index: {}]   ;;  %s1267_s8 = inlined_call_operand.hbm [shape: f32[128,128], index: 8, kind: input, shape index: {}]   ;;  %s1268_s9 = inlined_call_operand.vmem [shape: f32[1,128], index: 9, kind: input, shape index: {}]   ;;  %s1269_s10 = inlined_call_operand.hbm [shape: f32[16,128], index: 10, kind: output, shape index: {}]  }
   0x1   :  { %16 = vsyncpa [#allocation8], 0 }
   0x2   :  { %17 = vsyncpa [#allocation6], 0  ;;  %s1076_s13 = smov [#allocation4]  }
   0x3   :  { %s31_s14 = sshll.u32 %s1076_s13, 4  ;;  %s32_s14 = int_to_ptr.vmem [resolvable:$true] %s31_s14 }
   0x4   :  { %s1018_s15 = scalar_lea.vmem %s32_s14, 2048  ;;  %p1023_p1 = scmp.lt.s32.totalorder %s32_s14, %s32_s14 }
   0x5   :  { %p1019_p0 = scmp.ne.s32.totalorder %s32_s14, %s1018_s15  ;;  %p1024_p2 = scmp.lt.s32.totalorder %s1018_s15, %s1018_s15 }
   0x7   :  { %p1025_p3 = por %p1024_p2, %p1023_p1 }
   0x9   :  { %p1026_p4 = pnand %p1025_p3, %p1019_p0 }
   0xb   :  { %1029 = shalt.err (!%p1026_p4)
}
   0xc   :  { %s1077_s16 = smov 128   ;;  %s1078_s17 = smov 8  }
   0xd   :  { %37 = dma.hbm_to_vmem [thread:$0]  %s1263_s4, 2048, %s32_s14, [#allocation5], %s1077_s16, %s1077_s16, %s1078_s17  }
   0xe   :  { %s1079_s20 = smov [#allocation7]  }
   0xf   :  { %s49_s21 = sshll.u32 %s1079_s20, 4  ;;  %s50_s21 = int_to_ptr.vmem [resolvable:$true] %s49_s21 }
  0x10   :  { %s1038_s22 = scalar_lea.vmem %s50_s21, 2048  ;;  %p1043_p6 = scmp.lt.s32.totalorder %s50_s21, %s50_s21 }
  0x11   :  { %p1039_p5 = scmp.ne.s32.totalorder %s50_s21, %s1038_s22  ;;  %p1044_p7 = scmp.lt.s32.totalorder %s1038_s22, %s1038_s22 }
  0x13   :  { %p1045_p8 = por %p1044_p7, %p1043_p6 }
  0x15   :  { %p1046_p9 = pnand %p1045_p8, %p1039_p5 }
  0x17   :  { %1049 = shalt.err (!%p1046_p9)
}
  0x18   :  { %55 = dma.hbm_to_vmem [thread:$0]  %s1267_s8, 2048, %s50_s21, [#allocation8], %s1077_s16, %s1077_s16, %s1078_s17  }
  0x19   :  { %1070 = dma.done.wait [#allocation5], 2048  }
  0x1a   :  { %1071 = vsyncadd [#allocation5], 4294965248 }
  0x1b   :  { %1072 = dma.done.wait [#allocation8], 2048  }
  0x1c   :  { %1073 = vsyncadd [#allocation8], 4294965248  ;;  %v374_v0 = vlaneseq  ;;  %v86_v2 = vld [vmem:[#allocation4 + $0x78] sm:$0xff]  ;;  %v85_v3 = vld [vmem:[#allocation4 + $0x70] sm:$0xff]  ;;  %v1080_v13 = vmov 0.0   ;;  %vm252_vm5 = vcmask 130048  }
  0x1d   :  { %857 = vmatprep.subr.mxu0 %v86_v2  ;;  %v84_v4 = vld [vmem:[#allocation4 + $0x68] sm:$0xff]  ;;  %v83_v6 = vld [vmem:[#allocation4 + $0x60] sm:$0xff]  ;;  %v82_v7 = vld [vmem:[#allocation4 + $0x58] sm:$0xff]  ;;  %vm1081_vm6 = vmmov 0   ;;  %s1083_s28 = smov [#allocation9]  }
  0x1e   :  { %v375_v1 = vshrl.u32 %v374_v0, 7  ;;  %858 = vmatpush3.msra.mxu0 %v86_v2  ;;  %v69_v8 = vld [vmem:[%s1261_s2] sm:$0xff]  ;;  %v81_v9 = vld [vmem:[#allocation4 + $0x50] sm:$0xff]  ;;  %v80_v12 = vld [vmem:[#allocation4 + $0x48] sm:$0xff] }
  0x1f   :  { %859 = vmatprep.subr.mxu0 %v85_v3  ;;  %889 = vmatprep.mubr.f32.mxu0 %v69_v8  ;;  %v771_v10 = vld [vmem:[%s1259_s0] ss:$0 sm:$0xff]  ;;  %v79_v18 = vld [vmem:[#allocation4 + $0x40] sm:$0xff]  ;;  %v77_v20 = vld [vmem:[#allocation4 + $0x30] sm:$0xff]  ;;  %s737_s0 = sshll.u32 %s1083_s28, 4  ;;  %s738_s0 = int_to_ptr.vmem [resolvable:$true] %s737_s0 }
  0x20   :  { %v376_v5 = vadd.s32 8, %v375_v1  ;;  %860 = vmatpush3.msra.mxu0 %v85_v3  ;;  %v772_v11 = vld [vmem:[%s1260_s1] ss:$0 sm:$0xff]  ;;  %vm382_vm0 = vcmp.eq.s32.totalorder %v771_v10, %v375_v1  ;;  %v76_v21 = vld [vmem:[#allocation4 + $0x28] sm:$0xff]  ;;  %v75_v22 = vld [vmem:[#allocation4 + $0x20] sm:$0xff]  ;;  %p1055_p11 = scmp.lt.s32.totalorder %s738_s0, %s738_s0 }
  0x21   :  { %861 = vmatprep.subr.mxu0 %v84_v4  ;;  %vm392_vm2 = vcmp.eq.s32.totalorder %v772_v11, %v375_v1  ;;  %v384_v14 = vsel %vm382_vm0, 1.0, %v1080_v13  ;;  %v78_v19 = vld [vmem:[#allocation4 + $0x38] sm:$0xff]  ;;  %v73_v24 = vld [vmem:[#allocation4 + $0x10] sm:$0xff]  ;;  %v72_v25 = vld [vmem:[#allocation4 + $0x8] sm:$0xff] }
  0x22   :  { %862 = vmatpush3.msra.mxu0 %v84_v4  ;;  %vm383_vm1 = vcmp.eq.s32.totalorder %v771_v10, %v376_v5  ;;  %vm393_vm3 = vcmp.eq.s32.totalorder %v772_v11, %v376_v5  ;;  %v74_v23 = vld [vmem:[#allocation4 + $0x18] sm:$0xff]  ;;  %v71_v26 = vld [vmem:[#allocation4] sm:$0xff]  ;;  %v996_v32 = vld [vmem:[%s1262_s3 + $0x10] sm:$0xff]  }
  0x23   :  { %863 = vmatprep.subr.mxu0 %v83_v6  ;;  %v385_v15 = vsel %vm383_vm1, 1.0, %v1080_v13  ;;  %vm1162_vm4 = vmpackc.low %vm393_vm3, %vm392_vm2  ;;  %v70_v27 = vld [vmem:[%s1261_s2 + $0x8] sm:$0xff]  ;;  %v992_v28 = vld [vmem:[%s1265_s6] sm:$0xff]  }
  0x24   :  { %864 = vmatpush3.msra.mxu0 %v83_v6  ;;  %v386_v17 = vpack.c.bf16 %v385_v15, %v384_v14  ;;  %v993_v29 = vld [vmem:[%s1262_s3] sm:$0xff]   ;;  %892 = vmatprep.subr.bf16.mxu1 %v992_v28  ;;  %v994_v30 = vld [vmem:[%s1262_s3 + $0x8] sm:$0xff]   ;;  %v997_v33 = vld [vmem:[%s1262_s3 + $0x18] sm:$0xff]  }
  0x25   :  { %865 = vmatprep.subr.mxu0 %v82_v7  ;;  %893 = vmatpush3.bf16.msra.mxu1 %v992_v28  ;;  %v998_v34 = vld [vmem:[%s1262_s3 + $0x20] sm:$0xff]   ;;  %v999_v35 = vld [vmem:[%s1262_s3 + $0x28] sm:$0xff]   ;;  %v1000_v36 = vld [vmem:[%s1262_s3 + $0x30] sm:$0xff]  }
  0x26   :  { %866 = vmatpush3.msra.mxu0 %v82_v7  ;;  %399 = vxpose.xlu0.c.b16.start.end [1/1] (short) %v386_v17, 128  ;;  %v1001_v37 = vld [vmem:[%s1262_s3 + $0x38] sm:$0xff]   ;;  %v750_v39 = vld [vmem:[%s1264_s5] ss:$0 sm:$0xff]  ;;  %v631_v54 = vld [vmem:[#allocation7 + $0x68] sm:$0xff] }
  0x27   :  { %867 = vmatprep.subr.mxu0 %v81_v9  ;;  %894 = vmatprep.mubr.msk.bf16.mxu1 %vm252_vm5, %v993_v29  ;;  %v633_v52 = vld [vmem:[#allocation7 + $0x78] sm:$0xff]  ;;  %v632_v53 = vld [vmem:[#allocation7 + $0x70] sm:$0xff]  ;;  %v630_v55 = vld [vmem:[#allocation7 + $0x60] sm:$0xff] }
  0x28   :  { %868 = vmatpush3.msra.mxu0 %v81_v9  ;;  %928 = vmatprep.subr.bf16.mxu1 %v1080_v13  ;;  %v629_v56 = vld [vmem:[#allocation7 + $0x58] sm:$0xff]  ;;  %v628_v57 = vld [vmem:[#allocation7 + $0x50] sm:$0xff]  ;;  %v627_v58 = vld [vmem:[#allocation7 + $0x48] sm:$0xff] }
  0x29   :  { %869 = vmatprep.subr.mxu0 %v80_v12  ;;  %895 = vmatmul.mubr.msk.bf16.vlgmr.msra.gmra.mxu1 %vm252_vm5, %v994_v30  ;;  %v626_v59 = vld [vmem:[#allocation7 + $0x40] sm:$0xff]  ;;  %v625_v60 = vld [vmem:[#allocation7 + $0x38] sm:$0xff]  ;;  %v624_v61 = vld [vmem:[#allocation7 + $0x30] sm:$0xff] }
  0x2a   :  { %870 = vmatpush3.msra.mxu0 %v80_v12  ;;  %898 = vmatprep.mubr.msk.bf16.mxu1 %vm252_vm5, %v996_v32  ;;  %v623_v62 = vld [vmem:[#allocation7 + $0x28] sm:$0xff]  ;;  %v622_v63 = vld [vmem:[#allocation7 + $0x20] sm:$0xff]  ;;  %v621_v0 = vld [vmem:[#allocation7 + $0x18] sm:$0xff] }
  0x2b   :  { %871 = vmatprep.subr.mxu0 %v79_v18  ;;  %v620_v1 = vld [vmem:[#allocation7 + $0x10] sm:$0xff] }
  0x2c   :  { %872 = vmatpush3.msra.mxu0 %v79_v18 }
  0x2d   :  { %873 = vmatprep.subr.mxu0 %v78_v19 }
  0x2e   :  { %874 = vmatpush3.msra.mxu0 %v78_v19 }
  0x2f   :  { %875 = vmatprep.subr.mxu0 %v77_v20 }
  0x30   :  { %876 = vmatpush3.msra.mxu0 %v77_v20 }
  0x31   :  { %877 = vmatprep.subr.mxu0 %v76_v21  ;;  %899 = vmatmul.mubr.msk.bf16.gmra.mxu1 %vm252_vm5, %v997_v33 }
  0x32   :  { %878 = vmatpush3.msra.mxu0 %v76_v21  ;;  %902 = vmatprep.mubr.msk.bf16.mxu1 %vm252_vm5, %v998_v34 }
  0x33   :  { %879 = vmatprep.subr.mxu0 %v75_v22 }
  0x34   :  { %880 = vmatpush3.msra.mxu0 %v75_v22 }
  0x35   :  { %881 = vmatprep.subr.mxu0 %v74_v23 }
  0x36   :  { %882 = vmatpush3.msra.mxu0 %v74_v23 }
  0x37   :  { %883 = vmatprep.subr.mxu0 %v73_v24 }
  0x38   :  { %884 = vmatpush3.msra.mxu0 %v73_v24 }
  0x39   :  { %885 = vmatprep.subr.mxu0 %v72_v25  ;;  %903 = vmatmul.mubr.msk.bf16.gmra.mxu1 %vm252_vm5, %v999_v35 }
  0x3a   :  { %886 = vmatpush3.msra.mxu0 %v72_v25  ;;  %906 = vmatprep.mubr.msk.bf16.mxu1 %vm252_vm5, %v1000_v36 }
  0x3b   :  { %887 = vmatprep.subr.mxu0 %v71_v26 }
  0x3c   :  { %888 = vmatpush3.msra.mxu0 %v71_v26 }
  0x3d   :  { %890 = vmatmul.mubr.f32.vlgmr.msra.gmra.mxu0 %v70_v27 }
  0x41   :  { %907 = vmatmul.mubr.msk.bf16.gmra.mxu1 %vm252_vm5, %v1001_v37 }
  0x42   :  { %944 = vmatprep.mubr.msk.bf16.mxu1 %vm1081_vm6, %v1080_v13 }
  0x88   :  { %v407_v31 = vpop.trf.xlu0 }
  0x89   :  { %912 = vmatprep.mubr.msk.bf16.mxu0 %vm252_vm5, %v407_v31  ;;  %v753_v31 = vld [vmem:[%s1266_s7] ss:$0 sm:$0xff] }
  0x8c   :  { %v408_v43 = vpop.trf.xlu0 }
  0x90   :  { %v409_v45 = vpop.trf.xlu0 }
  0x94   :  { %v410_v47 = vpop.trf.xlu0 }
  0x98   :  { %v411_v48 = vpop.trf.xlu0 }
  0x9c   :  { %v412_v49 = vpop.trf.xlu0 }
  0xa0   :  { %v413_v50 = vpop.trf.xlu0 }
  0xa4   :  { %v414_v51 = vpop.trf.xlu0 }
  0xe9   :  { %v1217_v2 = vpop.f32.mrf.mxu1 }
  0xeb   :  { %v1219_v3 = vpop.f32.mrf.mxu1 }
  0xed   :  { %v1221_v4 = vpop.f32.mrf.mxu1 }
  0xef   :  { %v1223_v5 = vpop.f32.mrf.mxu1 }
  0xf1   :  { %v900_v6 = vpop.f32.mrf.mxu1 }
  0xf3   :  { %v327_v7 = vpop.f32.mrf.mxu1 }
  0xf5   :  { %v901_v8 = vpop.f32.mrf.mxu1 }
  0xf7   :  { %v330_v9 = vpop.f32.mrf.mxu1 }
  0xf9   :  { %v904_v10 = vpop.f32.mrf.mxu1 }
  0xfb   :  { %v343_v14 = vpop.f32.mrf.mxu1 }
  0xfd   :  { %v891_v38 = vpop.f32.mrf.mxu0  ;;  %v905_v18 = vpop.f32.mrf.mxu1 }
  0xfe   :  { %v166_v41 = vadd.f32 %v891_v38, %v750_v39 }
  0xff   :  { %v160_v40 = vpop.f32.mrf.mxu0  ;;  %v346_v21 = vpop.f32.mrf.mxu1 }
 0x100   :  { %v161_v42 = vadd.f32 %v750_v39, %v160_v40 }
 0x101   :  { %v908_v24 = vpop.f32.mrf.mxu1 }
 0x102   :  { %v792_v44 = vpack.c.bf16 %v166_v41, %v161_v42  ;;  %v368_v33 = vadd.f32 %v908_v24, %v753_v31 }
 0x103   :  { %v359_v26 = vpop.f32.mrf.mxu1 }
 0x104   :  { %793 = vst [vmem:[#allocation2] sm:$0xff] %v792_v44   ;;  %v360_v42 = vadd.f32 %v753_v31, %v359_v26 }
 0x105   :  { %v909_v29 = vpop.f32.mrf.mxu1 }
 0x106   :  { %v371_v36 = vadd.f32 %v909_v29, %v753_v31 }
 0x107   :  { %v362_v34 = vpop.f32.mrf.mxu1 }
 0x108   :  { %v363_v38 = vadd.f32 %v753_v31, %v362_v34 }
 0x10b   :  { %v995_v46 = vld [vmem:[#allocation2] sm:$0xff]  }
 0x10c   :  { %910 = vmatprep.subr.bf16.mxu0 %v995_v46 }
 0x10d   :  { %911 = vmatpush3.bf16.msra.mxu0 %v995_v46  ;;  %v355_v46 = vadd.f32 %v905_v18, %v753_v31  ;;  %v315_v18 = vadd.f32 %v753_v31, %v1223_v5  ;;  %v619_v5 = vld [vmem:[#allocation7 + $0x8] sm:$0xff] }
 0x10e   :  { %948 = vmatprep.subr.mxu0 %v633_v52 }
 0x110   :  { %913 = vmatmul.mubr.msk.bf16.vlgmr.msra.gmra.mxu0 %vm252_vm5, %v408_v43 }
 0x111   :  { %916 = vmatprep.mubr.msk.bf16.mxu0 %vm252_vm5, %v409_v45  ;;  %949 = vmatpush3.msra.mxu0 %v633_v52  ;;  %v352_v45 = vadd.f32 %v904_v10, %v753_v31  ;;  %v344_v52 = vadd.f32 %v753_v31, %v343_v14  ;;  %v323_v10 = vadd.f32 %v1221_v4, %v753_v31 }
 0x112   :  { %950 = vmatprep.subr.mxu0 %v632_v53 }
 0x113   :  { %951 = vmatpush3.msra.mxu0 %v632_v53 }
 0x114   :  { %952 = vmatprep.subr.mxu0 %v631_v54 }
 0x115   :  { %953 = vmatpush3.msra.mxu0 %v631_v54 }
 0x116   :  { %954 = vmatprep.subr.mxu0 %v630_v55 }
 0x117   :  { %955 = vmatpush3.msra.mxu0 %v630_v55  ;;  %v336_v55 = vadd.f32 %v900_v6, %v753_v31 }
 0x118   :  { %917 = vmatmul.mubr.msk.bf16.gmra.mxu0 %vm252_vm5, %v410_v47  ;;  %956 = vmatprep.subr.mxu0 %v629_v56 }
 0x119   :  { %920 = vmatprep.mubr.msk.bf16.mxu0 %vm252_vm5, %v411_v48  ;;  %957 = vmatpush3.msra.mxu0 %v629_v56  ;;  %v339_v56 = vadd.f32 %v901_v8, %v753_v31 }
 0x11a   :  { %958 = vmatprep.subr.mxu0 %v628_v57 }
 0x11b   :  { %959 = vmatpush3.msra.mxu0 %v628_v57 }
 0x11c   :  { %960 = vmatprep.subr.mxu0 %v627_v58 }
 0x11d   :  { %961 = vmatpush3.msra.mxu0 %v627_v58 }
 0x11e   :  { %962 = vmatprep.subr.mxu0 %v626_v59 }
 0x11f   :  { %963 = vmatpush3.msra.mxu0 %v626_v59 }
 0x120   :  { %921 = vmatmul.mubr.msk.bf16.gmra.mxu0 %vm252_vm5, %v412_v49  ;;  %964 = vmatprep.subr.mxu0 %v625_v60 }
 0x121   :  { %924 = vmatprep.mubr.msk.bf16.mxu0 %vm252_vm5, %v413_v50  ;;  %965 = vmatpush3.msra.mxu0 %v625_v60  ;;  %v347_v50 = vadd.f32 %v753_v31, %v346_v21  ;;  %v331_v60 = vadd.f32 %v753_v31, %v330_v9 }
 0x122   :  { %966 = vmatprep.subr.mxu0 %v624_v61 }
 0x123   :  { %967 = vmatpush3.msra.mxu0 %v624_v61 }
 0x124   :  { %968 = vmatprep.subr.mxu0 %v623_v62 }
 0x125   :  { %969 = vmatpush3.msra.mxu0 %v623_v62  ;;  %v328_v62 = vadd.f32 %v753_v31, %v327_v7  ;;  %v312_v7 = vadd.f32 %v753_v31, %v1219_v3 }
 0x126   :  { %970 = vmatprep.subr.mxu0 %v622_v63 }
 0x127   :  { %971 = vmatpush3.msra.mxu0 %v622_v63 }
 0x128   :  { %925 = vmatmul.mubr.msk.bf16.gmra.mxu0 %vm252_vm5, %v414_v51  ;;  %972 = vmatprep.subr.mxu0 %v621_v0 }
 0x129   :  { %973 = vmatpush3.msra.mxu0 %v621_v0 }
 0x12a   :  { %974 = vmatprep.subr.mxu0 %v620_v1 }
 0x12b   :  { %975 = vmatpush3.msra.mxu0 %v620_v1  ;;  %v320_v1 = vadd.f32 %v1217_v2, %v753_v31 }
 0x12c   :  { %976 = vmatprep.subr.mxu0 %v619_v5 }
 0x12d   :  { %977 = vmatpush3.msra.mxu0 %v619_v5 }
 0x1d0   :  { %v1225_v11 = vpop.f32.mrf.mxu0 }
 0x1d1   :  { %v544_v9 = vmul.f32 %v1225_v11, %v320_v1  ;;  %v618_v11 = vld [vmem:[#allocation7] sm:$0xff] }
 0x1d2   :  { %v1227_v12 = vpop.f32.mrf.mxu0  ;;  %978 = vmatprep.subr.mxu0 %v618_v11 }
 0x1d3   :  { %v542_v4 = vmul.f32 %v1227_v12, %v312_v7  ;;  %979 = vmatpush3.msra.mxu0 %v618_v11 }
 0x1d4   :  { %v915_v15 = vpop.f32.mrf.mxu0 }
 0x1d5   :  { %v545_v8 = vmul.f32 %v915_v15, %v323_v10  ;;  %v1082_v15 = vmov 1.0|1.0  }
 0x1d6   :  { %v1229_v17 = vpop.f32.mrf.mxu0 }
 0x1d7   :  { %v543_v2 = vmul.f32 %v1229_v17, %v315_v18 }
 0x1d8   :  { %v918_v19 = vpop.f32.mrf.mxu0 }
 0x1d9   :  { %v548_v61 = vmul.f32 %v918_v19, %v336_v55  ;;  %v559_v19 = vpack.c.bf16 %v545_v8, %v544_v9 }
 0x1da   :  { %v495_v20 = vpop.f32.mrf.mxu0 }
 0x1db   :  { %v546_v6 = vmul.f32 %v495_v20, %v328_v62  ;;  %v558_v20 = vpack.c.bf16 %v543_v2, %v542_v4 }
 0x1dc   :  { %v919_v22 = vpop.f32.mrf.mxu0 }
 0x1dd   :  { %v549_v58 = vmul.f32 %v919_v22, %v339_v56 }
 0x1de   :  { %v498_v23 = vpop.f32.mrf.mxu0 }
 0x1df   :  { %v561_v63 = vpack.c.bf16 %v549_v58, %v548_v61  ;;  %v547_v0 = vmul.f32 %v498_v23, %v331_v60 }
 0x1e0   :  { %v922_v25 = vpop.f32.mrf.mxu0 }
 0x1e1   :  { %v552_v51 = vmul.f32 %v922_v25, %v352_v45  ;;  %v560_v14 = vpack.c.bf16 %v547_v0, %v546_v6 }
 0x1e2   :  { %v511_v27 = vpop.f32.mrf.mxu0 }
 0x1e3   :  { %v550_v57 = vmul.f32 %v511_v27, %v344_v52 }
 0x1e4   :  { %v923_v28 = vpop.f32.mrf.mxu0 }
 0x1e5   :  { %v553_v48 = vmul.f32 %v923_v28, %v355_v46 }
 0x1e6   :  { %v514_v30 = vpop.f32.mrf.mxu0 }
 0x1e7   :  { %v563_v53 = vpack.c.bf16 %v553_v48, %v552_v51  ;;  %v551_v54 = vmul.f32 %v514_v30, %v347_v50 }
 0x1e8   :  { %v926_v32 = vpop.f32.mrf.mxu0 }
 0x1e9   :  { %v556_v39 = vmul.f32 %v926_v32, %v368_v33  ;;  %v562_v59 = vpack.c.bf16 %v551_v54, %v550_v57 }
 0x1ea   :  { %v527_v35 = vpop.f32.mrf.mxu0 }
 0x1eb   :  { %v554_v47 = vmul.f32 %v527_v35, %v360_v42 }
 0x1ec   :  { %v927_v37 = vpop.f32.mrf.mxu0 }
 0x1ed   :  { %v557_v40 = vmul.f32 %v927_v37, %v371_v36 }
 0x1ee   :  { %v530_v41 = vpop.f32.mrf.mxu0 }
 0x1ef   :  { %v565_v43 = vpack.c.bf16 %v557_v40, %v556_v39  ;;  %v555_v44 = vmul.f32 %v530_v41, %v363_v38 }
 0x1f1   :  { %929 = vmatpush3.bf16.msra.mxu1 %v565_v43  ;;  %v564_v49 = vpack.c.bf16 %v555_v44, %v554_v47 }
 0x1f2   :  { %930 = vmatprep.subr.bf16.mxu1 %v1080_v13 }
 0x1f5   :  { %931 = vmatpush3.bf16.msra.mxu1 %v564_v49 }
 0x1f6   :  { %932 = vmatprep.subr.bf16.mxu1 %v1080_v13 }
 0x1f9   :  { %933 = vmatpush3.bf16.msra.mxu1 %v563_v53 }
 0x1fa   :  { %934 = vmatprep.subr.bf16.mxu1 %v1080_v13 }
 0x1fd   :  { %935 = vmatpush3.bf16.msra.mxu1 %v562_v59 }
 0x1fe   :  { %936 = vmatprep.subr.bf16.mxu1 %v1080_v13 }
 0x201   :  { %937 = vmatpush3.bf16.msra.mxu1 %v561_v63 }
 0x202   :  { %938 = vmatprep.subr.bf16.mxu1 %v1080_v13 }
 0x205   :  { %939 = vmatpush3.bf16.msra.mxu1 %v560_v14 }
 0x206   :  { %940 = vmatprep.subr.bf16.mxu1 %v1080_v13 }
 0x209   :  { %941 = vmatpush3.bf16.msra.mxu1 %v559_v19 }
 0x20a   :  { %942 = vmatprep.subr.bf16.mxu1 %v1080_v13  ;;  %v784_v13 = vld [vmem:[%s1268_s9] ss:$0 sm:$0xff]  ;;  %s1050_s9 = scalar_lea.vmem %s738_s0, 256 }
 0x20b   :  { %p1051_p10 = scmp.ne.s32.totalorder %s738_s0, %s1050_s9  ;;  %p1056_p12 = scmp.lt.s32.totalorder %s1050_s9, %s1050_s9 }
 0x20d   :  { %943 = vmatpush3.bf16.msra.mxu1 %v558_v20  ;;  %p1057_p13 = por %p1056_p12, %p1055_p11 }
 0x20f   :  { %p1058_p0 = pnand %p1057_p13, %p1051_p10 }
 0x210   :  { %945 = vmatmul.mubr.msk.bf16.vlgmr.msra.gmra.mxu1 %vm1162_vm4, %v1082_v15 }
 0x2d0   :  { %v602_v3 = vpop.f32.mrf.mxu1 }
 0x2d1   :  { %980 = vmatprep.mubr.f32.mxu0 %v602_v3 }
 0x2d2   :  { %v946_v17 = vpop.f32.mrf.mxu1 }
 0x2d4   :  { %v605_v21 = vpop.f32.mrf.mxu1 }
 0x2d5   :  { %981 = vmatmul.mubr.f32.vlgmr.msra.gmra.mxu0 %v605_v21 }
 0x2d6   :  { %v947_v12 = vpop.f32.mrf.mxu1 }
 0x395   :  { %v982_v22 = vpop.f32.mrf.mxu0 }
 0x396   :  { %v713_v23 = vadd.f32 %v982_v22, %v784_v13 }
 0x397   :  { %v707_v16 = vpop.f32.mrf.mxu0 }
 0x398   :  { %v786_v24 = vmul.f32 -1.442695, %v713_v23  ;;  %v708_v25 = vadd.f32 %v784_v13, %v707_v16 }
 0x39a   :  { %1002 = vpow2.f32 %v786_v24  ;;  %v785_v26 = vmul.f32 -1.442695, %v708_v25 }
 0x39c   :  { %1004 = vpow2.f32 %v785_v26 }
 0x3a7   :  { %v1003_v27 = vpop.eup %1002 }
 0x3a8   :  { %v723_v28 = vadd.f32 1.0, %v1003_v27 }
 0x3a9   :  { %v1005_v29 = vpop.eup %1004 }
 0x3aa   :  { %1006 = vrcp.f32 %v723_v28  ;;  %v722_v30 = vadd.f32 1.0, %v1005_v29 }
 0x3ac   :  { %1008 = vrcp.f32 %v722_v30 }
 0x3b7   :  { %v1007_v31 = vpop.eup %1006 }
 0x3b8   :  { %v729_v32 = vmul.f32 %v1007_v31, %v713_v23 }
 0x3b9   :  { %v1009_v33 = vpop.eup %1008 }
 0x3ba   :  { %731 = vst [vmem:[#allocation9 + $0x8] sm:$0xff] %v729_v32  ;;  %v728_v34 = vmul.f32 %v1009_v33, %v708_v25 }
 0x3bc   :  { %730 = vst [vmem:[#allocation9] sm:$0xff] %v728_v34 }
 0x3bd   :  { %1061 = shalt.err (!%p1058_p0)
}
 0x3be   :  { %743 = dma.vmem_to_hbm [thread:$0]  %s738_s0, 256, %s1269_s10, [#allocation6], %s1077_s16, %s1077_s16, %s1078_s17  }
 0x3bf   :  { %1074 = dma.done.wait [#allocation6], 256  }
 0x3c0   :  { %1075 = vsyncadd [#allocation6], 4294967040 }
 0x3c1   :  { %747 = vsyncpa [#allocation5], 1 }
 0x3c2   :  { %748 = vsyncpa [#allocation8], 1 }
 0x3c3   :  { %749 = vsyncpa [#allocation6], 1 }

</bundles_post_ra>
